<compile_context>
chip_gen: v6e
topology: v6e:2x2x1
jax: 0.10.0
libtpu: 0.0.40
codegen_flags: <defaults>
</compile_context>

<pallas_src>
import jax
import jax.numpy as jnp
from jax.experimental import pallas as pl
from jax.experimental.pallas import tpu as pltpu


_HEAD_W2_ROW = 8  # w2 starts on a sublane-aligned row of the packed head buffer


def mlp_kernel(t_ref,        # scalar prefetch (SMEM); consumed by the index_maps
               x_ref,        # (B, D)
               head_ref,     # packed head params: (8 + H + 8, H)
               tail1_ref,    # packed tail[t] layer 1: (1, H + 8, H)
               tail2_ref,    # packed tail[t] layer 2: (1, H + 8, 2*D)
               out_ref):     # (B, 2*D): [:, :D] = mu, [:, D:] = std
    del t_ref  # only needed by the BlockSpec index_maps

    D = x_ref.shape[1]
    H = tail1_ref.shape[2]

    x = x_ref[...]                                   # (B, D)
    hp = head_ref[...]                               # (8 + H + 8, H)

    # ---- head layer 1: Linear(D -> H) as VPU broadcast-FMAs (K = D is tiny) ----
    w1 = hp[0:D, :]                                  # (D, H)
    b1 = hp[D:D + 1, :]                              # (1, H)
    h = b1 + x[:, 0:1] * w1[0:1, :]
    for i in range(1, D):                            # D is static -> unrolls
        h = h + x[:, i:i + 1] * w1[i:i + 1, :]
    h = jnp.maximum(h, 0.0)

    # ---- head layer 2: Linear(H -> H) on the MXU ----
    w2 = hp[_HEAD_W2_ROW:_HEAD_W2_ROW + H, :]        # (H, H)
    b2 = hp[_HEAD_W2_ROW + H:_HEAD_W2_ROW + H + 1, :]  # (1, H)
    h = jnp.dot(h, w2, preferred_element_type=jnp.float32) + b2
    h = jnp.maximum(h, 0.0)

    # ---- tail[t] layer 1: Linear(H -> H) ----
    t1 = tail1_ref[0]                                # (H + 8, H)
    h = jnp.dot(h, t1[0:H, :], preferred_element_type=jnp.float32) + t1[H:H + 1, :]
    h = jnp.maximum(h, 0.0)

    # ---- tail[t] layer 2: Linear(H -> 2D) ----
    t2 = tail2_ref[0]                                # (H + 8, 2*D)
    out = jnp.dot(h, t2[0:H, :], preferred_element_type=jnp.float32) + t2[H:H + 1, :]

    # First D lanes: mu (identity). Last D lanes: std = exp(0.5 * logvar).
    lane = jax.lax.broadcasted_iota(jnp.int32, out.shape, 1)
    out_ref[...] = jnp.where(lane < D, out, jnp.exp(0.5 * out))


def pack_params(params):
    """Pack the 8 raw parameter tensors into 3 DMA-friendly buffers.

    Layouts (rows are sublane-aligned so in-kernel slices are cheap):
      head : rows [0,D) = w1, row D = b1, rows [8,8+H) = w2, row 8+H = b2
      tail1: [N, H+8, H]   rows [0,H) = tw1[n], row H = tb1[n]
      tail2: [N, H+8, 2D]  rows [0,H) = tw2[n], row H = tb2[n]
    """
    w1, b1, w2, b2, tw1, tb1, tw2, tb2 = params
    D, H = w1.shape
    N = tw1.shape[0]

    head = jnp.zeros((_HEAD_W2_ROW + H + 8, H), jnp.float32)
    head = head.at[0:D, :].set(w1)
    head = head.at[D:D + 1, :].set(b1)
    head = head.at[_HEAD_W2_ROW:_HEAD_W2_ROW + H, :].set(w2)
    head = head.at[_HEAD_W2_ROW + H:_HEAD_W2_ROW + H + 1, :].set(b2)

    tail1 = jnp.zeros((N, H + 8, H), jnp.float32)
    tail1 = tail1.at[:, 0:H, :].set(tw1)
    tail1 = tail1.at[:, H, :].set(tb1)

    tail2 = jnp.zeros((N, H + 8, 2 * D), jnp.float32)
    tail2 = tail2.at[:, 0:H, :].set(tw2)
    tail2 = tail2.at[:, H, :].set(tb2)
    return head, tail1, tail2


def mlp_forward(x, packed_params, t):
    """x: (B, D) float32; packed_params from pack_params(); t: int or int32 array.

    Returns (mu, std), each (B, D).
    """
    head, tail1, tail2 = packed_params
    B, D = x.shape
    H = head.shape[1]

    # Accepts a prebuilt device int32 array (preferred in a sampling loop) or an int.
    t_arr = jnp.asarray(t, dtype=jnp.int32).reshape((1,))

    grid_spec = pltpu.PrefetchScalarGridSpec(
        num_scalar_prefetch=1,
        grid=(1,),
        in_specs=[
            pl.BlockSpec((B, D), lambda i, tref: (0, 0)),                     # x
            pl.BlockSpec(head.shape, lambda i, tref: (0, 0)),                 # head pack
            pl.BlockSpec((1, H + 8, H), lambda i, tref: (tref[0], 0, 0)),     # tail1[t]
            pl.BlockSpec((1, H + 8, 2 * D), lambda i, tref: (tref[0], 0, 0)),  # tail2[t]
        ],
        out_specs=pl.BlockSpec((B, 2 * D), lambda i, tref: (0, 0)),
    )

    out = pl.pallas_call(
        mlp_kernel,
        grid_spec=grid_spec,
        out_shape=jax.ShapeDtypeStruct((B, 2 * D), jnp.float32),
        compiler_params=pltpu.CompilerParams(
            dimension_semantics=("arbitrary",),
        ),
    )(t_arr, x, head, tail1, tail2)

    return out[:, :D], out[:, D:]


def init_params(key, N=40, data_dim=2, hidden_dim=64):
    """Deterministic synthetic init mimicking nn.Linear's U(-1/sqrt(fan_in), +)."""
    ks = jax.random.split(key, 8)

    def lin(k, fan_in, fan_out):
        bound = 1.0 / jnp.sqrt(fan_in)
        kw, kb = jax.random.split(k)
        w = jax.random.uniform(kw, (fan_in, fan_out), jnp.float32, -bound, bound)
        b = jax.random.uniform(kb, (1, fan_out), jnp.float32, -bound, bound)
        return w, b

    w1, b1 = lin(ks[0], data_dim, hidden_dim)
    w2, b2 = lin(ks[1], hidden_dim, hidden_dim)

    def tail_lin(k, fan_in, fan_out):
        bound = 1.0 / jnp.sqrt(fan_in)
        kw, kb = jax.random.split(k)
        w = jax.random.uniform(kw, (N, fan_in, fan_out), jnp.float32, -bound, bound)
        b = jax.random.uniform(kb, (N, fan_out), jnp.float32, -bound, bound)
        return w, b

    tw1, tb1 = tail_lin(ks[2], hidden_dim, hidden_dim)
    tw2, tb2 = tail_lin(ks[3], hidden_dim, 2 * data_dim)
    return (w1, b1, w2, b2, tw1, tb1, tw2, tb2)


def mlp_reference(x, params, t):
    """Pure-JAX reference of the PyTorch forward for sanity checking."""
    w1, b1, w2, b2, tw1, tb1, tw2, tb2 = params
    h = jnp.maximum(x @ w1 + b1, 0.0)
    h = jnp.maximum(h @ w2 + b2, 0.0)
    h = jnp.maximum(h @ tw1[t] + tb1[t][None, :], 0.0)
    out = h @ tw2[t] + tb2[t][None, :]
    d = x.shape[-1]
    mu, lv = out[:, :d], out[:, d:]
    return mu, jnp.sqrt(jnp.exp(lv))


if __name__ == "__main__":
    key = jax.random.PRNGKey(0)
    k_param, k_x = jax.random.split(key)

    N, data_dim, hidden_dim = 40, 2, 64
    B = 64
    t_step = 17  # valid timestep index in [0, N)

    params = init_params(k_param, N=N, data_dim=data_dim, hidden_dim=hidden_dim)
    packed = pack_params(params)
    x = jax.random.normal(k_x, (B, data_dim), dtype=jnp.float32)

    # Build the timestep index on-device once (no per-call host transfer in a loop).
    t_arr = jnp.array([t_step], dtype=jnp.int32)

    mu, std = mlp_forward(x, packed, t_arr)
    jax.block_until_ready((mu, std))

    mu_ref, std_ref = mlp_reference(x, params, t_step)
    assert jnp.allclose(mu, mu_ref, atol=1e-5, rtol=1e-5)
    assert jnp.allclose(std, std_ref, atol=1e-5, rtol=1e-5)

    print("KERNEL_OK")
</pallas_src>

<mosaic_0001>
module attributes {stable_mosaic.version = 11 : i64} {
  func.func @mlp_kernel(%arg0: i32, %arg1: memref<1xi32, #tpu.memory_space<smem>>, %arg2: memref<64x2xf32, #tpu.memory_space<vmem>>, %arg3: memref<80x64xf32, #tpu.memory_space<vmem>>, %arg4: memref<1x72x64xf32, #tpu.memory_space<vmem>>, %arg5: memref<1x72x4xf32, #tpu.memory_space<vmem>>, %arg6: memref<64x4xf32, #tpu.memory_space<vmem>>) attributes {dimension_semantics = [#tpu.dimension_semantics<arbitrary>], iteration_bounds = array<i64: 1>, scalar_prefetch = 1 : i64, scratch_operands = 0 : i64, tpu.core_type = #tpu.core_type<tc>, window_params = [{pipeline_mode = #tpu.pipeline_mode<synchronous>, transform_indices = @transform_0, window_bounds = array<i64: 64, 2>}, {pipeline_mode = #tpu.pipeline_mode<synchronous>, transform_indices = @transform_1, window_bounds = array<i64: 80, 64>}, {transform_indices = @transform_2, window_bounds = array<i64: 1, 72, 64>}, {transform_indices = @transform_3, window_bounds = array<i64: 1, 72, 4>}, {pipeline_mode = #tpu.pipeline_mode<synchronous>, transform_indices = @transform_4, window_bounds = array<i64: 64, 4>}]} {
    %c0 = arith.constant 0 : index
    %c0_0 = arith.constant 0 : index
    %0 = vector.load %arg2[%c0, %c0_0] : memref<64x2xf32, #tpu.memory_space<vmem>>, vector<64x2xf32>
    %c0_1 = arith.constant 0 : index
    %c0_2 = arith.constant 0 : index
    %1 = vector.load %arg3[%c0_1, %c0_2] : memref<80x64xf32, #tpu.memory_space<vmem>>, vector<80x64xf32>
    %2 = vector.extract_strided_slice %1 {offsets = [0, 0], sizes = [2, 64], strides = [1, 1]} : vector<80x64xf32> to vector<2x64xf32>
    %3 = vector.extract_strided_slice %1 {offsets = [2, 0], sizes = [1, 64], strides = [1, 1]} : vector<80x64xf32> to vector<1x64xf32>
    %4 = vector.extract_strided_slice %0 {offsets = [0, 0], sizes = [64, 1], strides = [1, 1]} : vector<64x2xf32> to vector<64x1xf32>
    %5 = vector.extract_strided_slice %2 {offsets = [0, 0], sizes = [1, 64], strides = [1, 1]} : vector<2x64xf32> to vector<1x64xf32>
    %6 = vector.broadcast %4 : vector<64x1xf32> to vector<64x64xf32>
    %7 = vector.broadcast %5 : vector<1x64xf32> to vector<64x64xf32>
    %8 = arith.mulf %6, %7 : vector<64x64xf32>
    %9 = vector.broadcast %3 : vector<1x64xf32> to vector<64x64xf32>
    %10 = arith.addf %9, %8 : vector<64x64xf32>
    %11 = vector.extract_strided_slice %0 {offsets = [0, 1], sizes = [64, 1], strides = [1, 1]} : vector<64x2xf32> to vector<64x1xf32>
    %12 = vector.extract_strided_slice %2 {offsets = [1, 0], sizes = [1, 64], strides = [1, 1]} : vector<2x64xf32> to vector<1x64xf32>
    %13 = vector.broadcast %11 : vector<64x1xf32> to vector<64x64xf32>
    %14 = vector.broadcast %12 : vector<1x64xf32> to vector<64x64xf32>
    %15 = arith.mulf %13, %14 : vector<64x64xf32>
    %16 = arith.addf %10, %15 : vector<64x64xf32>
    %cst = arith.constant 0.000000e+00 : f32
    %17 = vector.broadcast %cst : f32 to vector<64x64xf32>
    %18 = arith.maximumf %16, %17 : vector<64x64xf32>
    %19 = vector.extract_strided_slice %1 {offsets = [8, 0], sizes = [64, 64], strides = [1, 1]} : vector<80x64xf32> to vector<64x64xf32>
    %20 = vector.extract_strided_slice %1 {offsets = [72, 0], sizes = [1, 64], strides = [1, 1]} : vector<80x64xf32> to vector<1x64xf32>
    %cst_3 = arith.constant dense<0.000000e+00> : vector<64x64xf32>
    %21 = tpu.matmul %18, %19, %cst_3 {dimension_numbers = #tpu.dot_dimension_numbers<[1], [0], [0], [1], [0, 0, 1, 1], [], []>} : vector<64x64xf32>, vector<64x64xf32>, vector<64x64xf32> -> vector<64x64xf32>
    %22 = vector.broadcast %20 : vector<1x64xf32> to vector<64x64xf32>
    %23 = arith.addf %21, %22 : vector<64x64xf32>
    %cst_4 = arith.constant 0.000000e+00 : f32
    %24 = vector.broadcast %cst_4 : f32 to vector<64x64xf32>
    %25 = arith.maximumf %23, %24 : vector<64x64xf32>
    %c0_5 = arith.constant 0 : index
    %c0_6 = arith.constant 0 : index
    %c0_7 = arith.constant 0 : index
    %26 = vector.load %arg4[%c0_5, %c0_6, %c0_7] : memref<1x72x64xf32, #tpu.memory_space<vmem>>, vector<1x72x64xf32>
    %27 = vector.shape_cast %26 : vector<1x72x64xf32> to vector<72x64xf32>
    %28 = vector.extract_strided_slice %27 {offsets = [0, 0], sizes = [64, 64], strides = [1, 1]} : vector<72x64xf32> to vector<64x64xf32>
    %cst_8 = arith.constant dense<0.000000e+00> : vector<64x64xf32>
    %29 = tpu.matmul %25, %28, %cst_8 {dimension_numbers = #tpu.dot_dimension_numbers<[1], [0], [0], [1], [0, 0, 1, 1], [], []>} : vector<64x64xf32>, vector<64x64xf32>, vector<64x64xf32> -> vector<64x64xf32>
    %30 = vector.extract_strided_slice %27 {offsets = [64, 0], sizes = [1, 64], strides = [1, 1]} : vector<72x64xf32> to vector<1x64xf32>
    %31 = vector.broadcast %30 : vector<1x64xf32> to vector<64x64xf32>
    %32 = arith.addf %29, %31 : vector<64x64xf32>
    %cst_9 = arith.constant 0.000000e+00 : f32
    %33 = vector.broadcast %cst_9 : f32 to vector<64x64xf32>
    %34 = arith.maximumf %32, %33 : vector<64x64xf32>
    %c0_10 = arith.constant 0 : index
    %c0_11 = arith.constant 0 : index
    %c0_12 = arith.constant 0 : index
    %35 = vector.load %arg5[%c0_10, %c0_11, %c0_12] : memref<1x72x4xf32, #tpu.memory_space<vmem>>, vector<1x72x4xf32>
    %36 = vector.shape_cast %35 : vector<1x72x4xf32> to vector<72x4xf32>
    %37 = vector.extract_strided_slice %36 {offsets = [0, 0], sizes = [64, 4], strides = [1, 1]} : vector<72x4xf32> to vector<64x4xf32>
    %cst_13 = arith.constant dense<0.000000e+00> : vector<64x4xf32>
    %38 = tpu.matmul %34, %37, %cst_13 {dimension_numbers = #tpu.dot_dimension_numbers<[1], [0], [0], [1], [0, 0, 1, 1], [], []>} : vector<64x64xf32>, vector<64x4xf32>, vector<64x4xf32> -> vector<64x4xf32>
    %39 = vector.extract_strided_slice %36 {offsets = [64, 0], sizes = [1, 4], strides = [1, 1]} : vector<72x4xf32> to vector<1x4xf32>
    %40 = vector.broadcast %39 : vector<1x4xf32> to vector<64x4xf32>
    %41 = arith.addf %38, %40 : vector<64x4xf32>
    %42 = tpu.iota {dimensions = array<i32: 1>} : vector<64x4xi32>
    %c2_i32 = arith.constant 2 : i32
    %43 = vector.broadcast %c2_i32 : i32 to vector<64x4xi32>
    %44 = arith.cmpi slt, %42, %43 : vector<64x4xi32>
    %cst_14 = arith.constant 5.000000e-01 : f32
    %45 = vector.broadcast %cst_14 : f32 to vector<64x4xf32>
    %46 = arith.mulf %45, %41 : vector<64x4xf32>
    %47 = math.exp %46 : vector<64x4xf32>
    %48 = arith.select %44, %41, %47 : vector<64x4xi1>, vector<64x4xf32>
    %c0_15 = arith.constant 0 : index
    %c0_16 = arith.constant 0 : index
    %49 = vector.load %arg6[%c0_15, %c0_16] : memref<64x4xf32, #tpu.memory_space<vmem>>, vector<64x4xf32>
    tpu.vector_store %arg6[%c0_15, %c0_16], %48 {strides = array<i32>} : memref<64x4xf32, #tpu.memory_space<vmem>>, vector<64x4xf32>,
    return
  }
  func.func @transform_0(%arg0: i32, %arg1: memref<1xi32, #tpu.memory_space<smem>>) -> (i32, i32) {
    %c0_i32 = arith.constant 0 : i32
    %c0_i32_0 = arith.constant 0 : i32
    %c0_i32_1 = arith.constant 0 : i32
    return %c0_i32, %c0_i32_0 : i32, i32
  }
  func.func @transform_1(%arg0: i32, %arg1: memref<1xi32, #tpu.memory_space<smem>>) -> (i32, i32) {
    %c0_i32 = arith.constant 0 : i32
    %c0_i32_0 = arith.constant 0 : i32
    %c0_i32_1 = arith.constant 0 : i32
    return %c0_i32, %c0_i32_0 : i32, i32
  }
  func.func @transform_2(%arg0: i32, %arg1: memref<1xi32, #tpu.memory_space<smem>>) -> (i32, i32, i32) {
    %c0 = arith.constant 0 : index
    %0 = memref.load %arg1[%c0] : memref<1xi32, #tpu.memory_space<smem>>
    %c0_i32 = arith.constant 0 : i32
    %c0_i32_0 = arith.constant 0 : i32
    %c0_i32_1 = arith.constant 0 : i32
    return %0, %c0_i32, %c0_i32_0 : i32, i32, i32
  }
  func.func @transform_3(%arg0: i32, %arg1: memref<1xi32, #tpu.memory_space<smem>>) -> (i32, i32, i32) {
    %c0 = arith.constant 0 : index
    %0 = memref.load %arg1[%c0] : memref<1xi32, #tpu.memory_space<smem>>
    %c0_i32 = arith.constant 0 : i32
    %c0_i32_0 = arith.constant 0 : i32
    %c0_i32_1 = arith.constant 0 : i32
    return %0, %c0_i32, %c0_i32_0 : i32, i32, i32
  }
  func.func @transform_4(%arg0: i32, %arg1: memref<1xi32, #tpu.memory_space<smem>>) -> (i32, i32) {
    %c0_i32 = arith.constant 0 : i32
    %c0_i32_0 = arith.constant 0 : i32
    %c0_i32_1 = arith.constant 0 : i32
    return %c0_i32, %c0_i32_0 : i32, i32
  }
}

</mosaic_0001>

<bundles_post_ra>
// kernel: tpu_custom_call.1
= control target key start
LH: loop header
LB: loop body
LE: loop exit
PB: predicated region body
PF: predicated region fallthrough
CT: control target
= control target key end

     0   :  { %v898_v0 = vmov 1   ;;  %v899_v6 = vmov 0   ;;  %v117_v22 = vlaneseq  ;;  %vm205_vm0 = vcmask 523264   ;;  %s1097_s1 = inlined_call_operand.vmem [shape: f32[64,2], index: 1, kind: input, shape index: {}]   ;;  %s1098_s2 = inlined_call_operand.vmem [shape: f32[80,64], index: 2, kind: input, shape index: {}]   ;;  %s1099_s0 = inlined_call_operand.<no memory space> [shape: s32[1], index: 0, kind: input, shape index: {}]   ;;  %s1100_s3 = inlined_call_operand.vmem [shape: f32[40,72,64], index: 3, kind: input, shape index: {}]   ;;  %s1101_s4 = inlined_call_operand.vmem [shape: f32[40,72,4], index: 4, kind: input, shape index: {}]   ;;  %s1102_s5 = inlined_call_operand.vmem [shape: f32[64,4], index: 5, kind: output, shape index: {}]  }
   0x1   :  { %874 = vset.pattern.permute.xlu0 %v898_v0  ;;  %872 = vset.pattern.permute.xlu1 %v898_v0  ;;  %v61_v1 = vld [vmem:[%s1097_s1 + $0x10] sm:$0xff]  ;;  %v59_v2 = vld [vmem:[%s1097_s1] sm:$0xff]  ;;  %v60_v3 = vld [vmem:[%s1097_s1 + $0x8] sm:$0xff]  ;;  %p46_p0 = scmp.lt.s32.totalorder %s1099_s0, 39  ;;  %vm670_vm2 = vcmask 31744  }
   0x2   :  { %150 = vperm.xlu0 %874, %v61_v1   ;;  %142 = vperm.xlu1 %872, %v59_v2   ;;  %v75_v4 = vld [vmem:[%s1098_s2 + $0x40] sm:$0xff]  ;;  %v74_v5 = vld [vmem:[%s1098_s2 + $0x38] sm:$0xff]  ;;  %v73_v7 = vld [vmem:[%s1098_s2 + $0x30] sm:$0xff]  ;;  %v118_v23 = vshrl.u32 %v117_v22, 7 }
   0x3   :  { %769 = vmatprep.subr.mxu0 %v75_v4  ;;  %v62_v8 = vld [vmem:[%s1097_s1 + $0x18] sm:$0xff]  ;;  %v72_v9 = vld [vmem:[%s1098_s2 + $0x28] sm:$0xff]  ;;  %v71_v10 = vld [vmem:[%s1098_s2 + $0x20] sm:$0xff]  ;;  %s1104_s0 = smov (!%p46_p0, %s1099_s0), 39 }
   0x4   :  { %770 = vmatpush3.msra.mxu0 %v75_v4  ;;  %v70_v11 = vld [vmem:[%s1098_s2 + $0x18] sm:$0xff]  ;;  %v64_v12 = vld [vmem:[%s1097_s1 + $0x28] sm:$0xff]  ;;  %v69_v13 = vld [vmem:[%s1098_s2 + $0x10] sm:$0xff]  ;;  %s869_s29 = smul.u32 72, %s1104_s0  ;;  %v999_v24 = vsub.s32 0, %v118_v23  ;;  %v175_v25 = vsub.s32 1, %v118_v23 }
   0x5   :  { %771 = vmatprep.subr.mxu0 %v74_v5  ;;  %v63_v14 = vld [vmem:[%s1097_s1 + $0x20] sm:$0xff]  ;;  %v68_v15 = vld [vmem:[%s1098_s2 + $0x8] sm:$0xff]  ;;  %v65_v16 = vld [vmem:[%s1097_s1 + $0x30] sm:$0xff]  ;;  %v131_v28 = vsub.s32 2, %v118_v23 }
   0x6   :  { %875 = vset.pattern.permute.xlu0 %v899_v6  ;;  %146 = vperm.xlu1 %872, %v60_v3   ;;  %v66_v17 = vld [vmem:[%s1097_s1 + $0x38] sm:$0xff]  ;;  %s992_s1 = scalar_lea.vmem %s1100_s3, %s869_s29  ;;  %v67_v29 = vld [vmem:[%s1098_s2] sm:$0xff]  ;;  %s1022_s10 = scalar_lea.vmem %s1101_s4, %s869_s29 }
   0x7   :  { %79 = vperm.xlu0 %875, %v59_v2   ;;  %772 = vmatpush3.msra.mxu0 %v74_v5  ;;  %v350_v18 = vld [vmem:[%s992_s1 + $0x38] sm:$0xff]  ;;  %v349_v19 = vld [vmem:[%s992_s1 + $0x30] sm:$0xff]  ;;  %v348_v20 = vld [vmem:[%s992_s1 + $0x28] sm:$0xff]  ;;  %v120_v30 = vrot.slane %v67_v29, %v999_v24  ;;  %v176_v31 = vrot.slane %v67_v29, %v175_v25  ;;  %v132_v33 = vrot.slane %v67_v29, %v131_v28 }
   0x8   :  { %773 = vmatprep.subr.mxu0 %v73_v7  ;;  %797 = vmatprep.subr.mxu1 %v350_v18  ;;  %v347_v21 = vld [vmem:[%s992_s1 + $0x20] sm:$0xff]  ;;  %v346_v25 = vld [vmem:[%s992_s1 + $0x18] sm:$0xff] }
   0x9   :  { %774 = vmatpush3.msra.mxu0 %v73_v7  ;;  %798 = vmatpush3.msra.mxu1 %v350_v18  ;;  %v343_v28 = vld [vmem:[%s992_s1] sm:$0xff]  ;;  %v500_v29 = vld [vmem:[%s1022_s10 + $0x38] sm:$0xff] }
   0xa   :  { %873 = vset.pattern.permute.xlu1 %v899_v6  ;;  %775 = vmatprep.subr.mxu0 %v72_v9 }
   0xb   :  { %84 = vperm.xlu0 %875, %v60_v3   ;;  %94 = vperm.xlu1 %873, %v62_v8  }
   0xc   :  { %776 = vmatpush3.msra.mxu0 %v72_v9  ;;  %799 = vmatprep.subr.mxu1 %v349_v19 }
   0xd   :  { %777 = vmatprep.subr.mxu0 %v71_v10  ;;  %800 = vmatpush3.msra.mxu1 %v349_v19 }
   0xe   :  { %778 = vmatpush3.msra.mxu0 %v71_v10  ;;  %801 = vmatprep.subr.mxu1 %v348_v20 }
   0xf   :  { %89 = vperm.xlu0 %875, %v61_v1   ;;  %876 = vset.pattern.permute.xlu1 %v898_v0 }
  0x10   :  { %154 = vperm.xlu1 %876, %v62_v8   ;;  %779 = vmatprep.subr.mxu0 %v70_v11 }
  0x11   :  { %780 = vmatpush3.msra.mxu0 %v70_v11  ;;  %802 = vmatpush3.msra.mxu1 %v348_v20 }
  0x12   :  { %781 = vmatprep.subr.mxu0 %v69_v13  ;;  %803 = vmatprep.subr.mxu1 %v347_v21 }
  0x13   :  { %104 = vperm.xlu0 %875, %v64_v12   ;;  %782 = vmatpush3.msra.mxu0 %v69_v13 }
  0x14   :  { %877 = vset.pattern.permute.xlu1 %v899_v6  ;;  %783 = vmatprep.subr.mxu0 %v68_v15 }
  0x15   :  { %99 = vperm.xlu1 %877, %v63_v14   ;;  %784 = vmatpush3.msra.mxu0 %v68_v15 }
  0x16   :  { %804 = vmatpush3.msra.mxu1 %v347_v21  ;;  %825 = vmatprep.subr.mxu0 %v500_v29 }
  0x17   :  { %109 = vperm.xlu0 %875, %v65_v16   ;;  %805 = vmatprep.subr.mxu1 %v346_v25 }
  0x18   :  { %806 = vmatpush3.msra.mxu1 %v346_v25 }
  0x19   :  { %878 = vset.pattern.permute.xlu1 %v898_v0 }
  0x1a   :  { %158 = vperm.xlu1 %878, %v63_v14  }
  0x1b   :  { %880 = vset.pattern.permute.xlu0 %v898_v0 }
  0x1c   :  { %166 = vperm.xlu0 %880, %v65_v16  }
  0x1e   :  { %162 = vperm.xlu1 %878, %v64_v12  }
  0x22   :  { %879 = vset.pattern.permute.xlu1 %v899_v6 }
  0x23   :  { %114 = vperm.xlu1 %879, %v66_v17  }
  0x27   :  { %881 = vset.pattern.permute.xlu1 %v898_v0 }
  0x28   :  { %170 = vperm.xlu1 %881, %v66_v17  }
  0x7d   :  { %v143_v26 = vpop.permute.xlu1 %142  ;;  %v151_v27 = vpop.permute.xlu0 %150 }
  0x7e   :  { %v177_v36 = vmul.f32 %v176_v31, %v143_v26  ;;  %v179_v52 = vmul.f32 %v176_v31, %v151_v27  ;;  %v345_v26 = vld [vmem:[%s992_s1 + $0x10] sm:$0xff]  ;;  %v344_v27 = vld [vmem:[%s992_s1 + $0x8] sm:$0xff] }
  0x7f   :  { %807 = vmatprep.subr.mxu1 %v345_v26 }
  0x80   :  { %808 = vmatpush3.msra.mxu1 %v345_v26 }
  0x81   :  { %v147_v32 = vpop.permute.xlu1 %146  ;;  %809 = vmatprep.subr.mxu1 %v344_v27 }
  0x82   :  { %v80_v34 = vpop.permute.xlu0 %79  ;;  %v178_v43 = vmul.f32 %v176_v31, %v147_v32  ;;  %810 = vmatpush3.msra.mxu1 %v344_v27  ;;  %v497_v32 = vld [vmem:[%s1022_s10 + $0x20] sm:$0xff] }
  0x83   :  { %v121_v35 = vmul.f32 %v120_v30, %v80_v34  ;;  %811 = vmatprep.subr.mxu1 %v343_v28  ;;  %v501_v27 = vld [vmem:[%s1022_s10 + $0x40] sm:$0xff] }
  0x84   :  { %812 = vmatpush3.msra.mxu1 %v343_v28  ;;  %v505_v28 = vrot.slane %v501_v27, %v999_v24 }
  0x85   :  { %v133_v37 = vadd.f32 %v132_v33, %v121_v35  ;;  %853 = vmatprep.subr.mxu1 %v500_v29 }
  0x86   :  { %v85_v38 = vpop.permute.xlu0 %84  ;;  %v95_v39 = vpop.permute.xlu1 %94 }
  0x87   :  { %v122_v40 = vmul.f32 %v120_v30, %v85_v38  ;;  %v185_v41 = vadd.f32 %v177_v36, %v133_v37  ;;  %v124_v42 = vmul.f32 %v120_v30, %v95_v39 }
  0x89   :  { %v134_v44 = vadd.f32 %v132_v33, %v122_v40  ;;  %v193_v45 = vmax.f32 %v185_v41, 0.0  ;;  %v136_v50 = vadd.f32 %v132_v33, %v124_v42 }
  0x8a   :  { %v90_v46 = vpop.permute.xlu0 %89 }
  0x8b   :  { %v186_v47 = vadd.f32 %v178_v43, %v134_v44  ;;  %v123_v48 = vmul.f32 %v120_v30, %v90_v46  ;;  %785 = vmatprep.mubr.msk.f32.mxu0 %vm205_vm0, %v193_v45  ;;  %v155_v49 = vpop.permute.xlu1 %154 }
  0x8c   :  { %v180_v51 = vmul.f32 %v176_v31, %v155_v49 }
  0x8d   :  { %v194_v53 = vmax.f32 %v186_v47, 0.0  ;;  %v135_v54 = vadd.f32 %v132_v33, %v123_v48 }
  0x8e   :  { %v188_v55 = vadd.f32 %v180_v51, %v136_v50  ;;  %v105_v56 = vpop.permute.xlu0 %104 }
  0x8f   :  { %v187_v57 = vadd.f32 %v179_v52, %v135_v54  ;;  %786 = vmatmul.mubr.msk.f32.vlgmr.msra.gmra.mxu0 %vm205_vm0, %v194_v53  ;;  %v126_v1 = vmul.f32 %v120_v30, %v105_v56 }
  0x90   :  { %v100_v58 = vpop.permute.xlu1 %99  ;;  %v196_v60 = vmax.f32 %v188_v55, 0.0  ;;  %826 = vmatpush3.msra.mxu0 %v500_v29 }
  0x91   :  { %v195_v59 = vmax.f32 %v187_v57, 0.0  ;;  %v125_v61 = vmul.f32 %v120_v30, %v100_v58  ;;  %v138_v9 = vadd.f32 %v132_v33, %v126_v1 }
  0x92   :  { %v110_v62 = vpop.permute.xlu0 %109 }
  0x93   :  { %788 = vmatprep.mubr.msk.f32.mxu0 %vm205_vm0, %v195_v59  ;;  %v127_v63 = vmul.f32 %v120_v30, %v110_v62  ;;  %v137_v2 = vadd.f32 %v132_v33, %v125_v61  ;;  %v496_v59 = vld [vmem:[%s1022_s10 + $0x18] sm:$0xff]  ;;  %v494_v61 = vld [vmem:[%s1022_s10 + $0x8] sm:$0xff]  ;;  %v493_v62 = vld [vmem:[%s1022_s10] sm:$0xff] }
  0x94   :  { %789 = vmatmul.mubr.msk.f32.gmra.mxu0 %vm205_vm0, %v196_v60  ;;  %v495_v60 = vld [vmem:[%s1022_s10 + $0x10] sm:$0xff] }
  0x95   :  { %v159_v0 = vpop.permute.xlu1 %158  ;;  %v139_v7 = vadd.f32 %v132_v33, %v127_v63  ;;  %v351_v63 = vld [vmem:[%s992_s1 + $0x40] sm:$0xff] }
  0x96   :  { %v181_v3 = vmul.f32 %v176_v31, %v159_v0  ;;  %v355_v0 = vrot.slane %v351_v63, %v999_v24 }
  0x97   :  { %v167_v4 = vpop.permute.xlu0 %166 }
  0x98   :  { %v189_v5 = vadd.f32 %v181_v3, %v137_v2  ;;  %v183_v6 = vmul.f32 %v176_v31, %v167_v4 }
  0x99   :  { %v163_v8 = vpop.permute.xlu1 %162 }
  0x9a   :  { %v197_v10 = vmax.f32 %v189_v5, 0.0  ;;  %v182_v11 = vmul.f32 %v176_v31, %v163_v8  ;;  %v191_v12 = vadd.f32 %v183_v6, %v139_v7 }
  0x9c   :  { %v190_v13 = vadd.f32 %v182_v11, %v138_v9  ;;  %791 = vmatprep.mubr.msk.f32.mxu0 %vm205_vm0, %v197_v10  ;;  %v199_v16 = vmax.f32 %v191_v12, 0.0 }
  0x9e   :  { %v198_v14 = vmax.f32 %v190_v13, 0.0  ;;  %v115_v15 = vpop.permute.xlu1 %114 }
  0x9f   :  { %v128_v17 = vmul.f32 %v120_v30, %v115_v15  ;;  %v499_v30 = vld [vmem:[%s1022_s10 + $0x30] sm:$0xff] }
  0xa0   :  { %792 = vmatmul.mubr.msk.f32.gmra.mxu0 %vm205_vm0, %v198_v14  ;;  %827 = vmatprep.subr.mxu0 %v499_v30 }
  0xa1   :  { %794 = vmatprep.mubr.msk.f32.mxu0 %vm205_vm0, %v199_v16  ;;  %v140_v19 = vadd.f32 %v132_v33, %v128_v17  ;;  %828 = vmatpush3.msra.mxu0 %v499_v30  ;;  %v76_v33 = vld [vmem:[%s1098_s2 + $0x48] sm:$0xff] }
  0xa2   :  { %v204_v34 = vrot.slane %v76_v33, %v999_v24  ;;  %v636_v24 = vand.u32 127, %v117_v22 }
  0xa3   :  { %v171_v18 = vpop.permute.xlu1 %170 }
  0xa4   :  { %v184_v20 = vmul.f32 %v176_v31, %v171_v18  ;;  %v498_v31 = vld [vmem:[%s1022_s10 + $0x28] sm:$0xff]  ;;  %vm637_vm1 = vcmp.lt.s32.totalorder %v636_v24, 2 }
  0xa5   :  { %829 = vmatprep.subr.mxu0 %v498_v31 }
  0xa6   :  { %v192_v21 = vadd.f32 %v184_v20, %v140_v19  ;;  %830 = vmatpush3.msra.mxu0 %v498_v31 }
  0xa7   :  { %831 = vmatprep.subr.mxu0 %v497_v32 }
  0xa8   :  { %v200_v23 = vmax.f32 %v192_v21, 0.0  ;;  %832 = vmatpush3.msra.mxu0 %v497_v32 }
  0xa9   :  { %833 = vmatprep.subr.mxu0 %v496_v59 }
  0xaa   :  { %795 = vmatmul.mubr.msk.f32.gmra.mxu0 %vm205_vm0, %v200_v23 }
  0xab   :  { %834 = vmatpush3.msra.mxu0 %v496_v59 }
  0xac   :  { %835 = vmatprep.subr.mxu0 %v495_v60 }
  0xad   :  { %836 = vmatpush3.msra.mxu0 %v495_v60 }
  0xae   :  { %837 = vmatprep.subr.mxu0 %v494_v61 }
  0xaf   :  { %838 = vmatpush3.msra.mxu0 %v494_v61 }
  0xb0   :  { %839 = vmatprep.subr.mxu0 %v493_v62 }
  0xb1   :  { %840 = vmatpush3.msra.mxu0 %v493_v62 }
 0x14f   :  { %v787_v35 = vpop.f32.mrf.mxu0 }
 0x150   :  { %v302_v36 = vadd.f32 %v787_v35, %v204_v34 }
 0x151   :  { %v296_v37 = vpop.f32.mrf.mxu0 }
 0x152   :  { %v297_v38 = vadd.f32 %v296_v37, %v204_v34  ;;  %v336_v41 = vmax.f32 %v302_v36, 0.0 }
 0x154   :  { %v335_v39 = vmax.f32 %v297_v38, 0.0  ;;  %v790_v40 = vpop.f32.mrf.mxu0 }
 0x155   :  { %v312_v42 = vadd.f32 %v790_v40, %v204_v34 }
 0x156   :  { %v306_v43 = vpop.f32.mrf.mxu0  ;;  %813 = vmatprep.mubr.msk.f32.mxu1 %vm205_vm0, %v335_v39 }
 0x157   :  { %v307_v44 = vadd.f32 %v306_v43, %v204_v34  ;;  %814 = vmatmul.mubr.msk.f32.vlgmr.msra.gmra.mxu1 %vm205_vm0, %v336_v41  ;;  %v338_v46 = vmax.f32 %v312_v42, 0.0 }
 0x158   :  { %861 = vmatpush3.msra.mxu1 %v500_v29 }
 0x159   :  { %v337_v45 = vmax.f32 %v307_v44, 0.0  ;;  %854 = vmatprep.subr.mxu1 %v499_v30 }
 0x15a   :  { %862 = vmatpush3.msra.mxu1 %v499_v30 }
 0x15b   :  { %816 = vmatprep.mubr.msk.f32.mxu1 %vm205_vm0, %v337_v45  ;;  %855 = vmatprep.subr.mxu1 %v498_v31 }
 0x15c   :  { %817 = vmatmul.mubr.msk.f32.gmra.mxu1 %vm205_vm0, %v338_v46 }
 0x15d   :  { %863 = vmatpush3.msra.mxu1 %v498_v31 }
 0x15e   :  { %856 = vmatprep.subr.mxu1 %v497_v32 }
 0x15f   :  { %864 = vmatpush3.msra.mxu1 %v497_v32 }
 0x160   :  { %v793_v47 = vpop.f32.mrf.mxu0  ;;  %857 = vmatprep.subr.mxu1 %v496_v59 }
 0x161   :  { %v322_v48 = vadd.f32 %v793_v47, %v204_v34  ;;  %865 = vmatpush3.msra.mxu1 %v496_v59 }
 0x162   :  { %v316_v49 = vpop.f32.mrf.mxu0  ;;  %858 = vmatprep.subr.mxu1 %v495_v60 }
 0x163   :  { %v317_v50 = vadd.f32 %v316_v49, %v204_v34  ;;  %v340_v52 = vmax.f32 %v322_v48, 0.0  ;;  %866 = vmatpush3.msra.mxu1 %v495_v60 }
 0x164   :  { %859 = vmatprep.subr.mxu1 %v494_v61 }
 0x165   :  { %v339_v51 = vmax.f32 %v317_v50, 0.0  ;;  %867 = vmatpush3.msra.mxu1 %v494_v61 }
 0x166   :  { %860 = vmatprep.subr.mxu1 %v493_v62 }
 0x167   :  { %819 = vmatprep.mubr.msk.f32.mxu1 %vm205_vm0, %v339_v51  ;;  %868 = vmatpush3.msra.mxu1 %v493_v62 }
 0x168   :  { %820 = vmatmul.mubr.msk.f32.gmra.mxu1 %vm205_vm0, %v340_v52 }
 0x16a   :  { %v796_v53 = vpop.f32.mrf.mxu0 }
 0x16b   :  { %v332_v54 = vadd.f32 %v796_v53, %v204_v34 }
 0x16c   :  { %v326_v55 = vpop.f32.mrf.mxu0 }
 0x16d   :  { %v327_v56 = vadd.f32 %v326_v55, %v204_v34  ;;  %v342_v58 = vmax.f32 %v332_v54, 0.0 }
 0x16f   :  { %v341_v57 = vmax.f32 %v327_v56, 0.0 }
 0x171   :  { %822 = vmatprep.mubr.msk.f32.mxu1 %vm205_vm0, %v341_v57 }
 0x172   :  { %823 = vmatmul.mubr.msk.f32.gmra.mxu1 %vm205_vm0, %v342_v58 }
 0x217   :  { %v815_v1 = vpop.f32.mrf.mxu1 }
 0x218   :  { %v452_v2 = vadd.f32 %v815_v1, %v355_v0 }
 0x219   :  { %v446_v3 = vpop.f32.mrf.mxu1 }
 0x21a   :  { %v447_v4 = vadd.f32 %v446_v3, %v355_v0  ;;  %v486_v7 = vmax.f32 %v452_v2, 0.0 }
 0x21c   :  { %v485_v5 = vmax.f32 %v447_v4, 0.0  ;;  %v818_v6 = vpop.f32.mrf.mxu1 }
 0x21d   :  { %v462_v8 = vadd.f32 %v818_v6, %v355_v0 }
 0x21e   :  { %v456_v9 = vpop.f32.mrf.mxu1  ;;  %841 = vmatprep.mubr.msk.f32.mxu0 %vm205_vm0, %v485_v5 }
 0x21f   :  { %v457_v10 = vadd.f32 %v456_v9, %v355_v0  ;;  %842 = vmatmul.mubr.msk.f32.vlgmr.msra.gmra.mxu0 %vm205_vm0, %v486_v7  ;;  %v488_v12 = vmax.f32 %v462_v8, 0.0 }
 0x221   :  { %v487_v11 = vmax.f32 %v457_v10, 0.0 }
 0x223   :  { %844 = vmatprep.mubr.msk.f32.mxu0 %vm205_vm0, %v487_v11 }
 0x224   :  { %845 = vmatmul.mubr.msk.f32.gmra.mxu0 %vm205_vm0, %v488_v12 }
 0x228   :  { %v821_v13 = vpop.f32.mrf.mxu1 }
 0x229   :  { %v472_v14 = vadd.f32 %v821_v13, %v355_v0 }
 0x22a   :  { %v466_v15 = vpop.f32.mrf.mxu1 }
 0x22b   :  { %v467_v16 = vadd.f32 %v466_v15, %v355_v0  ;;  %v490_v18 = vmax.f32 %v472_v14, 0.0 }
 0x22d   :  { %v489_v17 = vmax.f32 %v467_v16, 0.0 }
 0x22f   :  { %847 = vmatprep.mubr.msk.f32.mxu1 %vm205_vm0, %v489_v17 }
 0x230   :  { %848 = vmatmul.mubr.msk.f32.vlgmr.msra.gmra.mxu1 %vm205_vm0, %v490_v18 }
 0x232   :  { %v824_v19 = vpop.f32.mrf.mxu1 }
 0x233   :  { %v482_v20 = vadd.f32 %v824_v19, %v355_v0 }
 0x234   :  { %v476_v21 = vpop.f32.mrf.mxu1 }
 0x235   :  { %v477_v23 = vadd.f32 %v476_v21, %v355_v0  ;;  %v492_v26 = vmax.f32 %v482_v20, 0.0 }
 0x237   :  { %v491_v25 = vmax.f32 %v477_v23, 0.0 }
 0x239   :  { %850 = vmatprep.mubr.msk.f32.mxu1 %vm205_vm0, %v491_v25 }
 0x23a   :  { %851 = vmatmul.mubr.msk.f32.gmra.mxu1 %vm205_vm0, %v492_v26 }
 0x2df   :  { %v843_v29 = vpop.f32.mrf.mxu0 }
 0x2e0   :  { %v602_v30 = vadd.f32 %v843_v29, %v505_v28 }
 0x2e1   :  { %v596_v31 = vpop.f32.mrf.mxu0 }
 0x2e2   :  { %v639_v32 = vmul.f32 0.5, %v602_v30  ;;  %v597_v33 = vadd.f32 %v596_v31, %v505_v28 }
 0x2e4   :  { %v648_v34 = vmul.f32 1.442695, %v639_v32  ;;  %v638_v35 = vmul.f32 0.5, %v597_v33  ;;  %v846_v36 = vpop.f32.mrf.mxu0 }
 0x2e5   :  { %v612_v37 = vadd.f32 %v846_v36, %v505_v28 }
 0x2e6   :  { %882 = vpow2.f32 %v648_v34  ;;  %v646_v38 = vmul.f32 1.442695, %v638_v35  ;;  %v606_v39 = vpop.f32.mrf.mxu0 }
 0x2e7   :  { %v641_v40 = vmul.f32 0.5, %v612_v37  ;;  %v607_v41 = vadd.f32 %v606_v39, %v505_v28 }
 0x2e8   :  { %884 = vpow2.f32 %v646_v38 }
 0x2e9   :  { %v652_v42 = vmul.f32 1.442695, %v641_v40  ;;  %v640_v43 = vmul.f32 0.5, %v607_v41 }
 0x2eb   :  { %886 = vpow2.f32 %v652_v42  ;;  %v650_v44 = vmul.f32 1.442695, %v640_v43 }
 0x2ed   :  { %888 = vpow2.f32 %v650_v44 }
 0x2f0   :  { %v849_v45 = vpop.f32.mrf.mxu1 }
 0x2f1   :  { %v622_v46 = vadd.f32 %v849_v45, %v505_v28 }
 0x2f2   :  { %v616_v47 = vpop.f32.mrf.mxu1 }
 0x2f3   :  { %v883_v48 = vpop.eup %882  ;;  %v643_v49 = vmul.f32 0.5, %v622_v46  ;;  %v617_v50 = vadd.f32 %v616_v47, %v505_v28 }
 0x2f4   :  { %v663_v51 = vsel %vm637_vm1, %v602_v30, %v883_v48 }
 0x2f5   :  { %v885_v52 = vpop.eup %884  ;;  %672 = vst.msk [vmem:[%s1102_s5 + $0x8] sm:$0xff] %vm670_vm2, %v663_v51  ;;  %v656_v53 = vmul.f32 1.442695, %v643_v49  ;;  %v642_v54 = vmul.f32 0.5, %v617_v50 }
 0x2f6   :  { %v662_v22 = vsel %vm637_vm1, %v597_v33, %v885_v52 }
 0x2f7   :  { %671 = vst.msk [vmem:[%s1102_s5] sm:$0xff] %vm670_vm2, %v662_v22  ;;  %890 = vpow2.f32 %v656_v53  ;;  %v654_v55 = vmul.f32 1.442695, %v642_v54 }
 0x2f8   :  { %v887_v56 = vpop.eup %886 }
 0x2f9   :  { %v665_v57 = vsel %vm637_vm1, %v612_v37, %v887_v56  ;;  %892 = vpow2.f32 %v654_v55 }
 0x2fa   :  { %v889_v58 = vpop.eup %888  ;;  %674 = vst.msk [vmem:[%s1102_s5 + $0x18] sm:$0xff] %vm670_vm2, %v665_v57  ;;  %v852_v59 = vpop.f32.mrf.mxu1 }
 0x2fb   :  { %v664_v60 = vsel %vm637_vm1, %v607_v41, %v889_v58  ;;  %v632_v61 = vadd.f32 %v852_v59, %v505_v28 }
 0x2fc   :  { %673 = vst.msk [vmem:[%s1102_s5 + $0x10] sm:$0xff] %vm670_vm2, %v664_v60  ;;  %v626_v62 = vpop.f32.mrf.mxu1 }
 0x2fd   :  { %v645_v63 = vmul.f32 0.5, %v632_v61  ;;  %v627_v0 = vadd.f32 %v626_v62, %v505_v28 }
 0x2ff   :  { %v660_v1 = vmul.f32 1.442695, %v645_v63  ;;  %v644_v2 = vmul.f32 0.5, %v627_v0 }
 0x301   :  { %894 = vpow2.f32 %v660_v1  ;;  %v658_v3 = vmul.f32 1.442695, %v644_v2 }
 0x303   :  { %896 = vpow2.f32 %v658_v3 }
 0x304   :  { %v891_v4 = vpop.eup %890 }
 0x305   :  { %v667_v5 = vsel %vm637_vm1, %v622_v46, %v891_v4 }
 0x306   :  { %v893_v6 = vpop.eup %892  ;;  %676 = vst.msk [vmem:[%s1102_s5 + $0x28] sm:$0xff] %vm670_vm2, %v667_v5 }
 0x307   :  { %v666_v7 = vsel %vm637_vm1, %v617_v50, %v893_v6 }
 0x308   :  { %675 = vst.msk [vmem:[%s1102_s5 + $0x20] sm:$0xff] %vm670_vm2, %v666_v7 }
 0x30e   :  { %v895_v8 = vpop.eup %894 }
 0x30f   :  { %v669_v9 = vsel %vm637_vm1, %v632_v61, %v895_v8 }
 0x310   :  { %v897_v10 = vpop.eup %896  ;;  %678 = vst.msk [vmem:[%s1102_s5 + $0x38] sm:$0xff] %vm670_vm2, %v669_v9 }
 0x311   :  { %v668_v11 = vsel %vm637_vm1, %v627_v0, %v897_v10 }
 0x312   :  { %677 = vst.msk [vmem:[%s1102_s5 + $0x30] sm:$0xff] %vm670_vm2, %v668_v11 }

</bundles_post_ra>
